<compile_context>
chip_gen: v7x
topology: tpu7x:2x2x1
jax: 0.10.0
libtpu: 0.0.40
codegen_flags: <defaults>
</compile_context>

<pallas_src>
import jax
import jax.numpy as jnp
from jax.experimental import pallas as pl
from jax.experimental.pallas import tpu as pltpu

OUT_DIM = 10  # Q-head width from the PyTorch module


def _round_up(x, m):
    return ((x + m - 1) // m) * m


def mlp_q_kernel(x_ref, w1_ref, w2_ref, w3_ref, b1_ref, b2_ref, b3_ref, o_ref):
    """Feature-major batch tile: activations are (features, tm), batch on lanes."""
    # Layer 1: (h1, in_dim) @ (in_dim, tm) -> (h1, tm), f32 accumulation on the MXU.
    h = jnp.dot(w1_ref[...], x_ref[...], preferred_element_type=jnp.float32)
    h = jnp.maximum(h + b1_ref[...], 0.0).astype(jnp.bfloat16)

    # Layer 2: (h2, h1) @ (h1, tm) -> (h2, tm).
    h = jnp.dot(w2_ref[...], h, preferred_element_type=jnp.float32)
    h = jnp.maximum(h + b2_ref[...], 0.0).astype(jnp.bfloat16)

    # Output head: (out, h2) @ (h2, tm) -> (out, tm); lane-dense, unpadded store.
    q = jnp.dot(w3_ref[...], h, preferred_element_type=jnp.float32) + b3_ref[...]
    o_ref[...] = q.astype(o_ref.dtype)


def prepare_params(params):
    """One-time weight prep (hoisted out of the per-call path).

    Transposes weights to feature-major, casts matmul operands to bf16 and
    keeps biases as f32 column vectors at their true per-layer widths.
    """
    w1, b1, w2, b2, w3, b3 = params
    return (
        jnp.asarray(w1.T, jnp.bfloat16),               # (h1, in_dim)
        jnp.asarray(w2.T, jnp.bfloat16),               # (h2, h1)
        jnp.asarray(w3.T, jnp.bfloat16),               # (out, h2)
        jnp.asarray(b1, jnp.float32).reshape(-1, 1),   # (h1, 1)
        jnp.asarray(b2, jnp.float32).reshape(-1, 1),   # (h2, 1)
        jnp.asarray(b3, jnp.float32).reshape(-1, 1),   # (out, 1)
    )


def mlp_q_forward(obs, act, prepped, *, tile_cols=1024):
    """obs: (B, obs_dim), act: (B, act_dim) -> (B, 10)."""
    w1t, w2t, w3t, b1, b2, b3 = prepped
    B = obs.shape[0]
    in_dim = w1t.shape[1]
    h1, h2, out_dim = w1t.shape[0], w2t.shape[0], w3t.shape[0]
    assert act.shape[0] == B
    assert obs.shape[1] + act.shape[1] == in_dim

    # Single layer-1 operand: cat(obs, act)^T in bf16 for the MXU (tiny (B, in_dim) pass).
    x_t = jnp.concatenate([obs.T, act.T], axis=0).astype(jnp.bfloat16)  # (in_dim, B)

    # Batch (lane-axis) tiling: tm is a multiple of 128; target >= 2 grid steps when
    # the batch allows it so v7x's two TensorCores both get work and DMA overlaps
    # compute.  VMEM footprint is a few hundred KiB at most — never the constraint.
    tile_cols = max(128, _round_up(tile_cols, 128))
    b128 = _round_up(B, 128)
    if b128 <= 128:
        tm = 128
    else:
        n_tiles = max(2, pl.cdiv(b128, tile_cols))
        tm = min(tile_cols, _round_up(pl.cdiv(b128, n_tiles), 128))
    grid = pl.cdiv(b128, tm)
    b_pad = grid * tm
    if b_pad != B:
        x_t = jnp.pad(x_t, ((0, 0), (0, b_pad - B)))

    resident = lambda i: (0, 0)  # weights/biases: same block every grid step

    q_t = pl.pallas_call(
        mlp_q_kernel,
        out_shape=jax.ShapeDtypeStruct((out_dim, b_pad), jnp.float32),
        grid=(grid,),
        in_specs=[
            pl.BlockSpec((in_dim, tm), lambda i: (0, i)),   # x^T batch tile
            pl.BlockSpec((h1, in_dim), resident),           # W1^T (resident)
            pl.BlockSpec((h2, h1), resident),               # W2^T (resident)
            pl.BlockSpec((out_dim, h2), resident),          # W3^T (resident)
            pl.BlockSpec((h1, 1), resident),                # b1
            pl.BlockSpec((h2, 1), resident),                # b2
            pl.BlockSpec((out_dim, 1), resident),           # b3
        ],
        out_specs=pl.BlockSpec((out_dim, tm), lambda i: (0, i)),
        compiler_params=pltpu.CompilerParams(
            dimension_semantics=("parallel",),  # shard batch tiles over v7x's two TCs
        ),
    )(x_t, w1t, w2t, w3t, b1, b2, b3)

    q = q_t[:, :B].T  # (B, out_dim)
    # torch.squeeze(q, -1): last dim is 10 (!= 1), so a no-op; kept for parity.
    return jnp.squeeze(q, axis=-1) if q.shape[-1] == 1 else q


def init_params(key, obs_dim, act_dim, hidden_sizes, out_dim=OUT_DIM):
    """Deterministic PyTorch-Linear-style init: U(-1/sqrt(fan_in), 1/sqrt(fan_in))."""
    sizes = [obs_dim + act_dim] + list(hidden_sizes) + [out_dim]
    params = []
    for fan_in, fan_out in zip(sizes[:-1], sizes[1:]):
        key, kw, kb = jax.random.split(key, 3)
        bound = 1.0 / jnp.sqrt(fan_in)
        w = jax.random.uniform(kw, (fan_in, fan_out), jnp.float32, -bound, bound)
        b = jax.random.uniform(kb, (1, fan_out), jnp.float32, -bound, bound)
        params += [w, b]
    return tuple(params)


if __name__ == "__main__":
    key = jax.random.PRNGKey(0)
    k_obs, k_act, k_par = jax.random.split(key, 3)

    batch, obs_dim, act_dim = 2, 11, 5
    hidden_sizes = (32, 32)

    obs = jax.random.normal(k_obs, (batch, obs_dim), jnp.float32)
    act = jax.random.normal(k_act, (batch, act_dim), jnp.float32)
    params = init_params(k_par, obs_dim, act_dim, hidden_sizes)

    prepped = prepare_params(params)          # one-time weight prep (cached in real use)
    q = mlp_q_forward(obs, act, prepped)
    jax.block_until_ready(q)

    # Sanity check against a plain-JAX f32 reference of the same MLP.
    x = jnp.concatenate([obs, act], axis=-1)
    w1, b1, w2, b2, w3, b3 = params
    ref = jnp.maximum(x @ w1 + b1, 0.0)
    ref = jnp.maximum(ref @ w2 + b2, 0.0)
    ref = ref @ w3 + b3

    assert q.shape == (batch, 10)
    # bf16 matmul operands with f32 accumulation -> loosened tolerance vs f32 ref.
    assert jnp.allclose(q, ref, atol=2e-2, rtol=2e-2)

    print("KERNEL_OK")
</pallas_src>

<mosaic_0001>
module attributes {stable_mosaic.version = 11 : i64} {
  func.func @mlp_q_kernel(%arg0: i32, %arg1: memref<16x128xbf16, #tpu.memory_space<vmem>>, %arg2: memref<32x16xbf16, #tpu.memory_space<vmem>>, %arg3: memref<32x32xbf16, #tpu.memory_space<vmem>>, %arg4: memref<10x32xbf16, #tpu.memory_space<vmem>>, %arg5: memref<32x1xf32, #tpu.memory_space<vmem>>, %arg6: memref<32x1xf32, #tpu.memory_space<vmem>>, %arg7: memref<10x1xf32, #tpu.memory_space<vmem>>, %arg8: memref<10x128xf32, #tpu.memory_space<vmem>>) attributes {dimension_semantics = [#tpu.dimension_semantics<parallel>], iteration_bounds = array<i64: 1>, scalar_prefetch = 0 : i64, scratch_operands = 0 : i64, tpu.core_type = #tpu.core_type<tc>, window_params = [{transform_indices = @transform_0, window_bounds = array<i64: 16, 128>}, {pipeline_mode = #tpu.pipeline_mode<synchronous>, transform_indices = @transform_1, window_bounds = array<i64: 32, 16>}, {pipeline_mode = #tpu.pipeline_mode<synchronous>, transform_indices = @transform_2, window_bounds = array<i64: 32, 32>}, {pipeline_mode = #tpu.pipeline_mode<synchronous>, transform_indices = @transform_3, window_bounds = array<i64: 10, 32>}, {pipeline_mode = #tpu.pipeline_mode<synchronous>, transform_indices = @transform_4, window_bounds = array<i64: 32, 1>}, {pipeline_mode = #tpu.pipeline_mode<synchronous>, transform_indices = @transform_5, window_bounds = array<i64: 32, 1>}, {pipeline_mode = #tpu.pipeline_mode<synchronous>, transform_indices = @transform_6, window_bounds = array<i64: 10, 1>}, {transform_indices = @transform_7, window_bounds = array<i64: 10, 128>}]} {
    %c0 = arith.constant 0 : index
    %c0_0 = arith.constant 0 : index
    %0 = vector.load %arg2[%c0, %c0_0] : memref<32x16xbf16, #tpu.memory_space<vmem>>, vector<32x16xbf16>
    %c0_1 = arith.constant 0 : index
    %c0_2 = arith.constant 0 : index
    %1 = vector.load %arg1[%c0_1, %c0_2] : memref<16x128xbf16, #tpu.memory_space<vmem>>, vector<16x128xbf16>
    %cst = arith.constant dense<0.000000e+00> : vector<32x128xf32>
    %2 = tpu.matmul %0, %1, %cst {dimension_numbers = #tpu.dot_dimension_numbers<[1], [0], [0], [1], [0, 0, 1, 1], [], []>} : vector<32x16xbf16>, vector<16x128xbf16>, vector<32x128xf32> -> vector<32x128xf32>
    %c0_3 = arith.constant 0 : index
    %c0_4 = arith.constant 0 : index
    %3 = vector.load %arg5[%c0_3, %c0_4] : memref<32x1xf32, #tpu.memory_space<vmem>>, vector<32x1xf32>
    %4 = vector.broadcast %3 : vector<32x1xf32> to vector<32x128xf32>
    %5 = arith.addf %2, %4 : vector<32x128xf32>
    %cst_5 = arith.constant 0.000000e+00 : f32
    %6 = vector.broadcast %cst_5 : f32 to vector<32x128xf32>
    %7 = arith.maximumf %5, %6 : vector<32x128xf32>
    %8 = arith.truncf %7 : vector<32x128xf32> to vector<32x128xbf16>
    %c0_6 = arith.constant 0 : index
    %c0_7 = arith.constant 0 : index
    %9 = vector.load %arg3[%c0_6, %c0_7] : memref<32x32xbf16, #tpu.memory_space<vmem>>, vector<32x32xbf16>
    %cst_8 = arith.constant dense<0.000000e+00> : vector<32x128xf32>
    %10 = tpu.matmul %9, %8, %cst_8 {dimension_numbers = #tpu.dot_dimension_numbers<[1], [0], [0], [1], [0, 0, 1, 1], [], []>} : vector<32x32xbf16>, vector<32x128xbf16>, vector<32x128xf32> -> vector<32x128xf32>
    %c0_9 = arith.constant 0 : index
    %c0_10 = arith.constant 0 : index
    %11 = vector.load %arg6[%c0_9, %c0_10] : memref<32x1xf32, #tpu.memory_space<vmem>>, vector<32x1xf32>
    %12 = vector.broadcast %11 : vector<32x1xf32> to vector<32x128xf32>
    %13 = arith.addf %10, %12 : vector<32x128xf32>
    %cst_11 = arith.constant 0.000000e+00 : f32
    %14 = vector.broadcast %cst_11 : f32 to vector<32x128xf32>
    %15 = arith.maximumf %13, %14 : vector<32x128xf32>
    %16 = arith.truncf %15 : vector<32x128xf32> to vector<32x128xbf16>
    %c0_12 = arith.constant 0 : index
    %c0_13 = arith.constant 0 : index
    %17 = vector.load %arg4[%c0_12, %c0_13] : memref<10x32xbf16, #tpu.memory_space<vmem>>, vector<10x32xbf16>
    %cst_14 = arith.constant dense<0.000000e+00> : vector<10x128xf32>
    %18 = tpu.matmul %17, %16, %cst_14 {dimension_numbers = #tpu.dot_dimension_numbers<[1], [0], [0], [1], [0, 0, 1, 1], [], []>} : vector<10x32xbf16>, vector<32x128xbf16>, vector<10x128xf32> -> vector<10x128xf32>
    %c0_15 = arith.constant 0 : index
    %c0_16 = arith.constant 0 : index
    %19 = vector.load %arg7[%c0_15, %c0_16] : memref<10x1xf32, #tpu.memory_space<vmem>>, vector<10x1xf32>
    %20 = vector.broadcast %19 : vector<10x1xf32> to vector<10x128xf32>
    %21 = arith.addf %18, %20 : vector<10x128xf32>
    %c0_17 = arith.constant 0 : index
    %c0_18 = arith.constant 0 : index
    %22 = vector.load %arg8[%c0_17, %c0_18] : memref<10x128xf32, #tpu.memory_space<vmem>>, vector<10x128xf32>
    tpu.vector_store %arg8[%c0_17, %c0_18], %21 {strides = array<i32>} : memref<10x128xf32, #tpu.memory_space<vmem>>, vector<10x128xf32>,
    return
  }
  func.func @transform_0(%arg0: i32) -> (i32, i32) {
    %c0_i32 = arith.constant 0 : i32
    %c0_i32_0 = arith.constant 0 : i32
    return %c0_i32, %arg0 : i32, i32
  }
  func.func @transform_1(%arg0: i32) -> (i32, i32) {
    %c0_i32 = arith.constant 0 : i32
    %c0_i32_0 = arith.constant 0 : i32
    %c0_i32_1 = arith.constant 0 : i32
    return %c0_i32, %c0_i32_0 : i32, i32
  }
  func.func @transform_2(%arg0: i32) -> (i32, i32) {
    %c0_i32 = arith.constant 0 : i32
    %c0_i32_0 = arith.constant 0 : i32
    %c0_i32_1 = arith.constant 0 : i32
    return %c0_i32, %c0_i32_0 : i32, i32
  }
  func.func @transform_3(%arg0: i32) -> (i32, i32) {
    %c0_i32 = arith.constant 0 : i32
    %c0_i32_0 = arith.constant 0 : i32
    %c0_i32_1 = arith.constant 0 : i32
    return %c0_i32, %c0_i32_0 : i32, i32
  }
  func.func @transform_4(%arg0: i32) -> (i32, i32) {
    %c0_i32 = arith.constant 0 : i32
    %c0_i32_0 = arith.constant 0 : i32
    %c0_i32_1 = arith.constant 0 : i32
    return %c0_i32, %c0_i32_0 : i32, i32
  }
  func.func @transform_5(%arg0: i32) -> (i32, i32) {
    %c0_i32 = arith.constant 0 : i32
    %c0_i32_0 = arith.constant 0 : i32
    %c0_i32_1 = arith.constant 0 : i32
    return %c0_i32, %c0_i32_0 : i32, i32
  }
  func.func @transform_6(%arg0: i32) -> (i32, i32) {
    %c0_i32 = arith.constant 0 : i32
    %c0_i32_0 = arith.constant 0 : i32
    %c0_i32_1 = arith.constant 0 : i32
    return %c0_i32, %c0_i32_0 : i32, i32
  }
  func.func @transform_7(%arg0: i32) -> (i32, i32) {
    %c0_i32 = arith.constant 0 : i32
    %c0_i32_0 = arith.constant 0 : i32
    return %c0_i32, %arg0 : i32, i32
  }
}

</mosaic_0001>

<bundles_post_ra>
// kernel: tpu_custom_call.1
= control target key start
LH: loop header
LB: loop body
LE: loop exit
PB: predicated region body
PF: predicated region fallthrough
CT: control target
= control target key end

     0   :  { %vm74_vm0 = vcmask 130048   ;;  %v398_v3 = vmov 0   ;;  %s507_s0 = inlined_call_operand.vmem [shape: bf16[16,128], index: 0, kind: input, shape index: {}]   ;;  %s508_s1 = inlined_call_operand.vmem [shape: bf16[32,16], index: 1, kind: input, shape index: {}]   ;;  %s509_s2 = inlined_call_operand.vmem [shape: bf16[32,32], index: 2, kind: input, shape index: {}]   ;;  %s510_s3 = inlined_call_operand.vmem [shape: bf16[10,32], index: 3, kind: input, shape index: {}]   ;;  %s511_s4 = inlined_call_operand.vmem [shape: f32[32,1], index: 4, kind: input, shape index: {}]   ;;  %s512_s5 = inlined_call_operand.vmem [shape: f32[32,1], index: 5, kind: input, shape index: {}]   ;;  %s513_s6 = inlined_call_operand.vmem [shape: f32[10,1], index: 6, kind: input, shape index: {}]   ;;  %s514_s7 = inlined_call_operand.hbm [shape: f32[10,128], index: 7, kind: output, shape index: {}]  }
   0x1   :  { %v368_v0 = vld [vmem:[%s507_s0] sm:$0xff]   ;;  %v370_v2 = vld [vmem:[%s508_s1 + $0x8] sm:$0xff]   ;;  %366 = vset.pattern.permute.xlu0 %v398_v3  ;;  %v36_v5 = vld [vmem:[%s511_s4 + $0x10] sm:$0xff]  ;;  %367 = vset.pattern.permute.xlu1 %v398_v3 }
   0x2   :  { %v369_v1 = vld [vmem:[%s508_s1] sm:$0xff]   ;;  %338 = vmatprep.subr.bf16.mxu0 %v368_v0  ;;  %50 = vperm.xlu1 %367, %v36_v5   ;;  %v35_v6 = vld [vmem:[%s511_s4 + $0x8] sm:$0xff]  ;;  %v37_v7 = vld [vmem:[%s511_s4 + $0x18] sm:$0xff] }
   0x3   :  { %339 = vmatpush3.bf16.msra.mxu0 %v368_v0  ;;  %340 = vmatprep.mubr.msk.bf16.mxu0 %vm74_vm0, %v369_v1  ;;  %v34_v4 = vld [vmem:[%s511_s4] sm:$0xff] }
   0x4   :  { %40 = vperm.xlu0 %366, %v34_v4  }
   0x6   :  { %341 = vmatmul.mubr.msk.bf16.vlgmr.msra.gmra.mrb[0].mxu0 %vm74_vm0, %v370_v2 }
   0x8   :  { %45 = vperm.xlu0 %366, %v35_v6  }
   0x9   :  { %12 = vsyncpa [#allocation3], 0  ;;  %55 = vperm.xlu1 %367, %v37_v7   ;;  %v140_v8 = vld [vmem:[%s512_s5] sm:$0xff]  ;;  %v141_v9 = vld [vmem:[%s512_s5 + $0x8] sm:$0xff]  ;;  %vm174_vm1 = vcmask 261120   ;;  %v399_v34 = vmov 0.0  }
   0xa   :  { %v142_v10 = vld [vmem:[%s512_s5 + $0x10] sm:$0xff]  ;;  %v143_v11 = vld [vmem:[%s512_s5 + $0x18] sm:$0xff]  ;;  %v238_v12 = vld [vmem:[%s513_s6] sm:$0xff]  ;;  %352 = vmatprep.subr.bf16.mxu0 %v399_v34  ;;  %vm400_vm2 = vmmov 0   ;;  %s401_s27 = smov [#allocation2]  }
   0xb   :  { %v239_v13 = vld [vmem:[%s513_s6 + $0x8] sm:$0x3]  ;;  %v371_v14 = vld [vmem:[%s509_s2] sm:$0xff]   ;;  %356 = vmatprep.mubr.msk.bf16.mxu0 %vm400_vm2, %v399_v34  ;;  %s306_s28 = sshll.u32 %s401_s27, 4  ;;  %s307_s28 = int_to_ptr.vmem [resolvable:$true] %s306_s28 }
   0xc   :  { %146 = vperm.xlu0 %366, %v140_v8   ;;  %348 = vmatprep.mubr.msk.bf16.mxu1 %vm174_vm1, %v371_v14  ;;  %v372_v33 = vld [vmem:[%s509_s2 + $0x8] sm:$0xff]   ;;  %v373_v53 = vld [vmem:[%s510_s3] sm:$0x1f]   ;;  %s374_s29 = scalar_lea.vmem %s307_s28, 256  ;;  %p379_p1 = scmp.lt.s32.totalorder %s307_s28, %s307_s28 }
   0xd   :  { %151 = vperm.xlu1 %367, %v141_v9   ;;  %p375_p0 = scmp.ne.s32.totalorder %s307_s28, %s374_s29  ;;  %p380_p2 = scmp.lt.s32.totalorder %s374_s29, %s374_s29 }
   0xf   :  { %p381_p3 = por %p380_p2, %p379_p1 }
  0x10   :  { %156 = vperm.xlu0 %366, %v142_v10  }
  0x11   :  { %161 = vperm.xlu1 %367, %v143_v11   ;;  %p382_p4 = pnand %p381_p3, %p375_p0 }
  0x14   :  { %242 = vperm.xlu0 %366, %v238_v12  }
  0x15   :  { %247 = vperm.xlu1 %367, %v239_v13  }
  0x81   :  { %v51_v15 = vpop.permute.xlu1 %50 }
  0x83   :  { %v41_v16 = vpop.permute.xlu0 %40 }
  0x87   :  { %v46_v23 = vpop.permute.xlu0 %45 }
  0x88   :  { %v56_v20 = vpop.permute.xlu1 %55 }
  0x8b   :  { %v147_v35 = vpop.permute.xlu0 %146 }
  0x8c   :  { %v152_v36 = vpop.permute.xlu1 %151 }
  0x8f   :  { %v157_v37 = vpop.permute.xlu0 %156 }
  0x90   :  { %v162_v41 = vpop.permute.xlu1 %161 }
  0x93   :  { %v243_v54 = vpop.permute.xlu0 %242 }
  0x94   :  { %v248_v58 = vpop.permute.xlu1 %247 }
  0xd9   :  { %v342_v17 = vpop.f32.mrb[0].mxu0 }
  0xda   :  { %v124_v18 = vadd.f32 %v342_v17, %v51_v15  ;;  %v115_v19 = vpop.f32.mrb[1].mxu0 }
  0xdb   :  { %v116_v21 = vadd.f32 %v115_v19, %v41_v16  ;;  %v343_v22 = vpop.f32.mrb[2].mxu0 }
  0xdc   :  { %v127_v24 = vadd.f32 %v343_v22, %v56_v20  ;;  %v118_v25 = vpop.f32.mrb[3].mxu0  ;;  %v132_v27 = vmax.f32 %v124_v18, 0.0 }
  0xdd   :  { %v119_v26 = vadd.f32 %v118_v25, %v46_v23  ;;  %v130_v29 = vmax.f32 %v116_v21, 0.0 }
  0xde   :  { %v133_v28 = vmax.f32 %v127_v24, 0.0 }
  0xdf   :  { %v131_v30 = vmax.f32 %v119_v26, 0.0 }
  0xe0   :  { %v135_v31 = vpack.c.bf16 %v133_v28, %v132_v27 }
  0xe1   :  { %v134_v32 = vpack.c.bf16 %v131_v30, %v130_v29 }
  0xe3   :  { %344 = vmatprep.subr.bf16.mxu1 %v134_v32 }
  0xe4   :  { %345 = vmatpush3.bf16.msra.mxu1 %v134_v32 }
  0xe5   :  { %346 = vmatprep.subr.bf16.mxu1 %v135_v31 }
  0xe8   :  { %347 = vmatpush3.bf16.msra.mxu1 %v135_v31 }
  0xeb   :  { %349 = vmatmul.mubr.msk.bf16.vlgmr.msra.gmra.mrb[0].mxu1 %vm174_vm1, %v372_v33 }
 0x1be   :  { %v350_v38 = vpop.f32.mrb[0].mxu1 }
 0x1bf   :  { %v224_v39 = vadd.f32 %v350_v38, %v157_v37  ;;  %v215_v40 = vpop.f32.mrb[1].mxu1 }
 0x1c0   :  { %v216_v42 = vadd.f32 %v215_v40, %v147_v35  ;;  %v351_v43 = vpop.f32.mrb[2].mxu1 }
 0x1c1   :  { %v227_v44 = vadd.f32 %v351_v43, %v162_v41  ;;  %v218_v45 = vpop.f32.mrb[3].mxu1  ;;  %v232_v47 = vmax.f32 %v224_v39, 0.0 }
 0x1c2   :  { %v219_v46 = vadd.f32 %v218_v45, %v152_v36  ;;  %v230_v49 = vmax.f32 %v216_v42, 0.0 }
 0x1c3   :  { %v233_v48 = vmax.f32 %v227_v44, 0.0 }
 0x1c4   :  { %v231_v50 = vmax.f32 %v219_v46, 0.0 }
 0x1c5   :  { %v235_v51 = vpack.c.bf16 %v233_v48, %v232_v47 }
 0x1c6   :  { %v234_v52 = vpack.c.bf16 %v231_v50, %v230_v49 }
 0x1c8   :  { %353 = vmatpush3.bf16.msra.mxu0 %v234_v52 }
 0x1c9   :  { %354 = vmatprep.subr.bf16.mxu0 %v399_v34 }
 0x1cc   :  { %355 = vmatpush3.bf16.msra.mxu0 %v235_v51 }
 0x1cf   :  { %357 = vmatmul.mubr.msk.bf16.vlgmr.msra.gmra.mrb[4].mxu0 %vm174_vm1, %v373_v53 }
 0x2a2   :  { %v292_v55 = vpop.f32.mrb[4].mxu0 }
 0x2a3   :  { %v293_v56 = vadd.f32 %v292_v55, %v243_v54  ;;  %v358_v57 = vpop.f32.mrb[5].mxu0 }
 0x2a4   :  { %v295_v59 = vpop.f32.mrb[6].mxu0 }
 0x2a5   :  { %299 = vst [vmem:[#allocation2] sm:$0xff] %v293_v56  ;;  %v296_v60 = vadd.f32 %v295_v59, %v248_v58  ;;  %v359_v61 = vpop.f32.mrb[7].mxu0 }
 0x2a7   :  { %300 = vst [vmem:[#allocation2 + $0x8] sm:$0x3] %v296_v60 }
 0x2a8   :  { %385 = shalt.err (!%p382_p4)
}
 0x2a9   :  { %s386_s8 = scalar_lea.hbm %s514_s7, 256 }
 0x2aa   :  { %p387_p5 = scmp.ne.s32.totalorder %s514_s7, %s386_s8  ;;  %p390_p6 = scmp.lt.u32.totalorder %s386_s8, %s514_s7 }
 0x2ac   :  { %p392_p7 = pnand %p390_p6, %p387_p5 }
 0x2ae   :  { %395 = shalt.err (!%p392_p7)
}
 0x2af   :  { %s402_s1 = smov 128   ;;  %s403_s12 = smov 8  }
 0x2b0   :  { %312 = dma.vmem_to_hbm [thread:$0]  %s307_s28, 256, %s514_s7, [#allocation3], %s402_s1, %s402_s1, %s403_s12  }
 0x2b1   :  { %396 = dma.done.wait [#allocation3], 256  }
 0x2b2   :  { %397 = vsyncadd [#allocation3], 4294967040 }
 0x2b3   :  { %316 = vsyncpa [#allocation3], 1 }

</bundles_post_ra>
